<compile_context>
chip_gen: v6e
topology: v6e:2x2x1
jax: 0.10.0
libtpu: 0.0.40
codegen_flags: <defaults>
</compile_context>

<pallas_src>
import jax
import jax.numpy as jnp
from jax.experimental import pallas as pl
from jax.experimental.pallas import tpu as pltpu


# ------------------------------- kernels ------------------------------------


def _pos_enc_add_lane_packed_kernel(x_ref, pe_ref, o_ref):
    # x_ref / o_ref: (ts, B*E); pe_ref: (ts, E).
    # Row s of the packed x view is [x[s,0,:], x[s,1,:], ..., x[s,B-1,:]] along the
    # lane axis, so the matching positional row is pe[s] repeated B times along lanes.
    e = pe_ref.shape[-1]
    b = x_ref.shape[-1] // e
    pe_tile = pe_ref[...]
    pe_row = pe_tile if b == 1 else jnp.concatenate([pe_tile] * b, axis=-1)
    o_ref[...] = x_ref[...] + pe_row


def _pos_enc_add_3d_kernel(x_ref, pe_ref, o_ref):
    # Fallback layout: x_ref / o_ref: (ts, B, E); pe_ref: (ts, 1, E) broadcasts over
    # the batch axis (minor two dims equal the full array dims, so always legal).
    o_ref[...] = x_ref[...] + pe_ref[...]


# ------------------------------ pe construction ------------------------------


def make_fixed_positional_encoding(embedding_dim: int, max_length: int = 512):
    """Deterministically build the pe buffer exactly like the PyTorch __init__."""
    position = jnp.arange(0, max_length, dtype=jnp.float32)[:, None]           # (L, 1)
    div_term = jnp.exp(
        jnp.arange(0, embedding_dim, 2, dtype=jnp.float32)
        * (-jnp.log(jnp.float32(10000.0)) / embedding_dim)
    )                                                                           # (E/2,)
    angles = position * div_term                                                # (L, E/2)
    pe = jnp.zeros((max_length, embedding_dim), dtype=jnp.float32)
    pe = pe.at[:, 0::2].set(jnp.sin(angles))
    pe = pe.at[:, 1::2].set(jnp.cos(angles))
    return pe[:, None, :]                                                       # (L, 1, E)


# ------------------------------ tiling helpers -------------------------------


def _choose_seq_tile(seq_len, row_bytes, target_bytes, min_grid, align):
    """Largest divisor of seq_len (multiple of `align` if possible) whose x/out block
    stays within `target_bytes`, preferring at least `min_grid` grid steps."""
    cands = [d for d in range(1, seq_len + 1) if seq_len % d == 0 and d % align == 0]
    if not cands:
        cands = [d for d in range(1, seq_len + 1) if seq_len % d == 0]
    fitting = [d for d in cands if d * row_bytes <= target_bytes] or [min(cands)]
    stepped = [d for d in fitting if seq_len // d >= min_grid] or fitting
    return max(stepped)


# --------------------------------- forward -----------------------------------


def fixed_positional_encoding_forward(
    x,
    pe,
    *,
    target_block_bytes: int = 2 * 1024 * 1024,   # ~1–4 MiB per x/out block
    min_grid_steps: int = 2,                     # keep both v7x TensorCores busy
    donate_x: bool = False,
):
    """x: (S, B, E). Returns x + pe[:S] with batch broadcasting (PyTorch semantics)."""
    S, B, E = x.shape
    L = pe.shape[0]
    if S > L:
        raise ValueError(f"sequence length {S} exceeds max_length {L}")
    if pe.shape[-1] != E:
        raise ValueError("embedding dim mismatch between x and pe")

    itemsize = x.dtype.itemsize
    row_bytes = B * E * itemsize                    # bytes of x per sequence position

    pe_flat = pe.reshape(L, E)
    if pe_flat.dtype != x.dtype:
        pe_flat = pe_flat.astype(x.dtype)

    if S % 8 == 0:
        # Lane-packed path: fold the batch into the lane axis -> dense vregs and
        # unmasked stores; sequence tile is sublane-aligned (multiple of 8).
        ts = _choose_seq_tile(S, row_bytes, target_block_bytes, min_grid_steps, align=8)
        kernel = _pos_enc_add_lane_packed_kernel
        operands = (x.reshape(S, B * E), pe_flat)
        in_specs = [
            pl.BlockSpec((ts, B * E), lambda i: (i, 0)),
            pl.BlockSpec((ts, E), lambda i: (i, 0)),   # indexes the FULL pe buffer
        ]
        out_spec = pl.BlockSpec((ts, B * E), lambda i: (i, 0))
        out_shape = jax.ShapeDtypeStruct((S, B * E), x.dtype)
    else:
        # Fallback for awkward sequence lengths: 3-D blocks whose minor two dims are
        # the full (B, E) extents (always satisfies tiling rules), still large tiles.
        ts = _choose_seq_tile(S, row_bytes, target_block_bytes, min_grid_steps, align=1)
        kernel = _pos_enc_add_3d_kernel
        operands = (x, pe_flat.reshape(L, 1, E))
        in_specs = [
            pl.BlockSpec((ts, B, E), lambda i: (i, 0, 0)),
            pl.BlockSpec((ts, 1, E), lambda i: (i, 0, 0)),
        ]
        out_spec = pl.BlockSpec((ts, B, E), lambda i: (i, 0, 0))
        out_shape = jax.ShapeDtypeStruct((S, B, E), x.dtype)

    grid = (S // ts,)

    # Raise the scoped VMEM limit only when the double-buffered working set needs it
    # (x + out + pe blocks, x2 buffers, ~1 MiB slack); cap well under v7x's 64 MiB.
    x_block_bytes = ts * B * E * itemsize
    pe_block_bytes = ts * E * itemsize
    est_vmem = 2 * (2 * x_block_bytes + pe_block_bytes) + (1 << 20)
    vmem_limit = None
    if est_vmem > 16 * 1024 * 1024:
        vmem_limit = min(est_vmem, 48 * 1024 * 1024)

    out = pl.pallas_call(
        kernel,
        out_shape=out_shape,
        grid_spec=pltpu.PrefetchScalarGridSpec(
            num_scalar_prefetch=0,
            grid=grid,
            in_specs=in_specs,
            out_specs=out_spec,
        ),
        compiler_params=pltpu.CompilerParams(
            dimension_semantics=("parallel",),
            vmem_limit_bytes=vmem_limit,
        ),
        input_output_aliases={0: 0} if donate_x else {},
    )(*operands)

    return out.reshape(S, B, E)


# ----------------------------------- demo ------------------------------------


if __name__ == "__main__":
    key = jax.random.PRNGKey(0)
    k1, k2, k3 = jax.random.split(key, 3)
    max_length = 512

    # 1) Small shape consistent with the module (seq-first, like the PyTorch forward).
    seq, batch, emb = 8, 2, 32
    x = jax.random.normal(k1, (seq, batch, emb), dtype=jnp.float32)
    pe = make_fixed_positional_encoding(emb, max_length)
    out = jax.block_until_ready(fixed_positional_encoding_forward(x, pe))
    ref = x + pe[:seq]
    assert out.shape == (seq, batch, emb)
    assert jnp.allclose(out, ref, atol=1e-6), "mismatch vs reference (small)"

    # 2) Slightly larger shape: exercises the multi-step, lane-packed tiled path.
    seq2, batch2, emb2 = 64, 4, 128
    x2 = jax.random.normal(k2, (seq2, batch2, emb2), dtype=jnp.float32)
    pe2 = make_fixed_positional_encoding(emb2, max_length)
    out2 = jax.block_until_ready(fixed_positional_encoding_forward(x2, pe2))
    ref2 = x2 + pe2[:seq2]
    assert jnp.allclose(out2, ref2, atol=1e-6), "mismatch vs reference (tiled)"

    # 3) Sequence length not divisible by 8: exercises the 3-D fallback path.
    seq3, batch3, emb3 = 6, 2, 32
    x3 = jax.random.normal(k3, (seq3, batch3, emb3), dtype=jnp.float32)
    pe3 = make_fixed_positional_encoding(emb3, max_length)
    out3 = jax.block_until_ready(fixed_positional_encoding_forward(x3, pe3))
    ref3 = x3 + pe3[:seq3]
    assert jnp.allclose(out3, ref3, atol=1e-6), "mismatch vs reference (fallback)"

    print("KERNEL_OK")
</pallas_src>

<mosaic_0001>
module attributes {stable_mosaic.version = 11 : i64} {
  func.func @_pos_enc_add_lane_packed_kernel(%arg0: i32, %arg1: memref<8x64xf32, #tpu.memory_space<vmem>>, %arg2: memref<8x32xf32, #tpu.memory_space<vmem>>, %arg3: memref<8x64xf32, #tpu.memory_space<vmem>>) attributes {dimension_semantics = [#tpu.dimension_semantics<parallel>], iteration_bounds = array<i64: 1>, scalar_prefetch = 0 : i64, scratch_operands = 0 : i64, tpu.core_type = #tpu.core_type<tc>, window_params = [{transform_indices = @transform_0, window_bounds = array<i64: 8, 64>}, {transform_indices = @transform_1, window_bounds = array<i64: 8, 32>}, {transform_indices = @transform_2, window_bounds = array<i64: 8, 64>}]} {
    %c0 = arith.constant 0 : index
    %c0_0 = arith.constant 0 : index
    %0 = vector.load %arg2[%c0, %c0_0] : memref<8x32xf32, #tpu.memory_space<vmem>>, vector<8x32xf32>
    %1 = tpu.concatenate %0, %0 in 1 : vector<8x32xf32>, vector<8x32xf32> -> vector<8x64xf32>
    %c0_1 = arith.constant 0 : index
    %c0_2 = arith.constant 0 : index
    %2 = vector.load %arg1[%c0_1, %c0_2] : memref<8x64xf32, #tpu.memory_space<vmem>>, vector<8x64xf32>
    %3 = arith.addf %2, %1 : vector<8x64xf32>
    %c0_3 = arith.constant 0 : index
    %c0_4 = arith.constant 0 : index
    %4 = vector.load %arg3[%c0_3, %c0_4] : memref<8x64xf32, #tpu.memory_space<vmem>>, vector<8x64xf32>
    tpu.vector_store %arg3[%c0_3, %c0_4], %3 {strides = array<i32>} : memref<8x64xf32, #tpu.memory_space<vmem>>, vector<8x64xf32>,
    return
  }
  func.func @transform_0(%arg0: i32) -> (i32, i32) {
    %c0_i32 = arith.constant 0 : i32
    %c0_i32_0 = arith.constant 0 : i32
    return %arg0, %c0_i32 : i32, i32
  }
  func.func @transform_1(%arg0: i32) -> (i32, i32) {
    %c0_i32 = arith.constant 0 : i32
    %c0_i32_0 = arith.constant 0 : i32
    return %arg0, %c0_i32 : i32, i32
  }
  func.func @transform_2(%arg0: i32) -> (i32, i32) {
    %c0_i32 = arith.constant 0 : i32
    %c0_i32_0 = arith.constant 0 : i32
    return %arg0, %c0_i32 : i32, i32
  }
}

</mosaic_0001>

<bundles_post_ra>
// kernel: tpu_custom_call.1
= control target key start
LH: loop header
LB: loop body
LE: loop exit
PB: predicated region body
PF: predicated region fallthrough
CT: control target
= control target key end

     0   :  { %s87_s0 = inlined_call_operand.vmem [shape: f32[8,64], index: 0, kind: input, shape index: {}]   ;;  %s88_s1 = inlined_call_operand.vmem [shape: f32[512,32], index: 1, kind: input, shape index: {}]   ;;  %s89_s2 = inlined_call_operand.hbm [shape: f32[8,64], index: 2, kind: output, shape index: {}]  }
   0x1   :  { %v12_v0 = vld [vmem:[%s88_s1] sm:$0xff] }
   0x2   :  { %7 = vsyncpa [#allocation3], 0  ;;  %s61_s11 = smov 32   ;;  %vm17_vm0 = vcmask 261120   ;;  %v19_v1 = vld [vmem:[%s87_s0] sm:$0xff]  ;;  %s62_s14 = smov [#allocation2]  }
   0x3   :  { %14 = vrot.lane.b32.xlu0 %v12_v0, %s61_s11  ;;  %s29_s15 = sshll.u32 %s62_s14, 4  ;;  %vm21_vm1 = vcmask 523264   ;;  %s30_s15 = int_to_ptr.vmem [resolvable:$true] %s29_s15 }
   0x4   :  { %s39_s16 = scalar_lea.vmem %s30_s15, 128  ;;  %p44_p1 = scmp.lt.s32.totalorder %s30_s15, %s30_s15 }
   0x5   :  { %p40_p0 = scmp.ne.s32.totalorder %s30_s15, %s39_s16  ;;  %p45_p2 = scmp.lt.s32.totalorder %s39_s16, %s39_s16 }
   0x7   :  { %p46_p3 = por %p45_p2, %p44_p1 }
   0x9   :  { %p47_p4 = pnand %p46_p3, %p40_p0 }
  0x75   :  { %v15_v2 = vpop.permute.xlu0 %14 }
  0x76   :  { %v18_v3 = vsel %vm17_vm0, %v12_v0, %v15_v2 }
  0x77   :  { %v20_v4 = vadd.f32 %v19_v1, %v18_v3 }
  0x79   :  { %22 = vst.msk [vmem:[#allocation2] sm:$0xff] %vm21_vm1, %v20_v4 }
  0x7a   :  { %50 = shalt.err (!%p47_p4)
}
  0x7b   :  { %32 = dma.vmem_to_hbm [thread:$0]  %s30_s15, 128, %s89_s2, [#allocation3]  }
  0x7c   :  { %59 = dma.done.wait [#allocation3], 128  }
  0x7d   :  { %60 = vsyncadd [#allocation3], 4294967168 }
  0x7e   :  { %36 = vsyncpa [#allocation3], 1 }

</bundles_post_ra>
